<compile_context>
chip_gen: v5e
topology: v5e:2x2
jax: 0.10.0
libtpu: 0.0.40
codegen_flags: <defaults>
</compile_context>

<pallas_src>
import jax
import jax.numpy as jnp
from jax import lax
from jax.experimental import pallas as pl
from jax.experimental.pallas import tpu as pltpu

_EPS = 1e-8          # matches torch.nn.functional.cosine_similarity default eps
_PROTO_ROWS = 8      # 2 real prototypes padded to a native sublane count


def _round_up(x, m):
    return (x + m - 1) // m * m


def _cosine_kernel(protos_ref, emb_ref, logits_ref):
    """One grid step: scaled cosine similarity of one embedding tile vs all prototypes.

    protos_ref: (8, D)   VMEM  L2-normalized prototypes * exp(scale); rows 2..7 are zero
    emb_ref:    (tn, D)  VMEM  tile of raw embeddings (support or query), native dtype
    logits_ref: (8, tn)  VMEM  lane-dense logits tile; row p = similarity to prototype p
    """
    emb = emb_ref[...]                                   # (tn, D)
    emb32 = emb.astype(jnp.float32)
    sq = emb32 * emb32                                   # single VALU pass over the tile

    d = emb.shape[-1]
    # Row-wise sum of squares reduced on the MXU so the result is already a
    # lane-dense (*, tn) row (avoids an XLU lane reduction + transpose).
    ss = lax.dot_general(jnp.ones((_PROTO_ROWS, d), jnp.float32), sq,
                         (((1,), (1,)), ((), ())),
                         preferred_element_type=jnp.float32)      # (8, tn), rows identical
    # 1 / max(||e||, eps) == rsqrt(max(||e||^2, eps^2)); EUP op on a tiny (1, tn) row.
    inv_row = lax.rsqrt(jnp.maximum(ss[0:1, :], _EPS * _EPS))     # (1, tn)

    raw = lax.dot_general(protos_ref[...], emb,
                          (((1,), (1,)), ((), ())),
                          preferred_element_type=jnp.float32)     # (8, tn)
    # Fold the embedding norm into the tiny output instead of normalizing (tn, D).
    logits_ref[...] = raw * inv_row


def _pick_tile(n_rows, d, itemsize):
    """Rows per tile: one boundary-free block when small, else a lane-aligned,
    VMEM-budgeted tile (<= ~4 MiB per buffer; double-buffered stays well inside
    v5e/v6e/v7x scoped-VMEM defaults), capped at 2048 so large N yields several
    grid steps for v7x's two TensorCores."""
    d_lanes = _round_up(d, 128)
    budget_rows = max(128, (4 * 1024 * 1024) // (d_lanes * itemsize))
    if n_rows <= budget_rows and n_rows <= 2048:
        return n_rows                       # block == full dims: always layout-legal
    return max(128, (min(budget_rows, 2048) // 128) * 128)


def _cosine_logits(protos8, emb):
    """exp(scale) * cosine_similarity(emb, prototypes) -> (N, 2), one pallas_call."""
    n, d = emb.shape
    tn = _pick_tile(n, d, emb.dtype.itemsize)
    logits8 = pl.pallas_call(
        _cosine_kernel,
        out_shape=jax.ShapeDtypeStruct((_PROTO_ROWS, n), jnp.float32),
        grid=(pl.cdiv(n, tn),),
        in_specs=[
            pl.BlockSpec((_PROTO_ROWS, d), lambda i: (0, 0)),   # constant prototype block
            pl.BlockSpec((tn, d), lambda i: (i, 0)),            # streamed embedding tiles
        ],
        out_specs=pl.BlockSpec((_PROTO_ROWS, tn), lambda i: (0, i)),
        compiler_params=pltpu.CompilerParams(
            dimension_semantics=("parallel",)),
    )(protos8, emb)
    return logits8[:2].T                                        # (N, 2): [neg, pos]


def protonet_forward(s_emb, s_y, q_emb, scale):
    """ProtoNet.forward given encoder outputs (mol_encoder is external).

    s_emb: (Ns, D) support embeddings (f32 or bf16 — kept in their native dtype)
    s_y:   (Ns,)   binary support labels
    q_emb: (Nq, D) query embeddings
    scale: (1,)    learnable scale; logits are multiplied by exp(scale)
    Returns (s_logits (Ns, 2), q_logits (Nq, 2)), column order [neg, pos].
    """
    # ---- prototype construction, hoisted out of the kernel (tiny XLA work) ----
    y = s_y.astype(jnp.float32)
    s32 = s_emb.astype(jnp.float32)
    # NOTE: a single-class support set divides by a zero count -> inf/nan,
    # matching the PyTorch module's behavior.
    pos_vec = (y @ s32) / jnp.sum(y)
    neg_vec = ((1.0 - y) @ s32) / jnp.sum(1.0 - y)
    protos = jnp.stack([neg_vec, pos_vec], axis=0)               # (2, D), f32
    p_inv = lax.rsqrt(jnp.maximum(
        jnp.sum(protos * protos, axis=-1, keepdims=True), _EPS * _EPS))
    protos_n = protos * (p_inv * jnp.exp(scale[0]))              # exp(scale) folded in
    protos8 = jnp.pad(protos_n, ((0, _PROTO_ROWS - 2), (0, 0)))  # native-sublane MXU lhs
    protos8 = protos8.astype(s_emb.dtype)                        # match emb dtype for the MXU

    # ---- similarity logits: same kernel on support and query slabs; no concat/pad copy ----
    s_logits = _cosine_logits(protos8, s_emb)
    q_logits = _cosine_logits(protos8, q_emb)
    return s_logits, q_logits


def _reference(s_emb, s_y, q_emb, scale):
    """Pure-JAX reference mirroring the PyTorch math."""
    pos_vec = jnp.sum(s_emb * s_y[:, None], axis=0) / jnp.sum(s_y)
    neg_vec = jnp.sum(s_emb * (1.0 - s_y)[:, None], axis=0) / jnp.sum(1.0 - s_y)
    protos = jnp.stack([neg_vec, pos_vec], axis=0)               # (2, D)

    def cos(emb):
        num = emb @ protos.T
        en = jnp.maximum(jnp.linalg.norm(emb, axis=-1, keepdims=True), _EPS)
        pn = jnp.maximum(jnp.linalg.norm(protos, axis=-1, keepdims=True), _EPS)
        return jnp.exp(scale[0]) * num / (en * pn.T)

    return cos(s_emb), cos(q_emb)


if __name__ == "__main__":
    key = jax.random.PRNGKey(0)
    k_s, k_q = jax.random.split(key)

    Ns, Nq, D = 8, 16, 32                      # small shapes: 8 support, 16 query, emb_dim=32
    s_emb = jax.random.normal(k_s, (Ns, D), jnp.float32)
    q_emb = jax.random.normal(k_q, (Nq, D), jnp.float32)
    s_y = jnp.array([0, 1, 0, 1, 1, 0, 1, 0], jnp.float32)   # binary task labels
    scale = jnp.zeros((1,), jnp.float32)       # nn.Parameter(torch.zeros(1))

    s_logits, q_logits = protonet_forward(s_emb, s_y, q_emb, scale)
    jax.block_until_ready((s_logits, q_logits))

    ref_s, ref_q = _reference(s_emb, s_y, q_emb, scale)
    assert s_logits.shape == (Ns, 2) and q_logits.shape == (Nq, 2)
    assert jnp.allclose(s_logits, ref_s, atol=1e-4, rtol=1e-4)
    assert jnp.allclose(q_logits, ref_q, atol=1e-4, rtol=1e-4)

    print("KERNEL_OK")
</pallas_src>

<mosaic_0001>
module attributes {stable_mosaic.version = 11 : i64} {
  func.func @_cosine_kernel(%arg0: i32, %arg1: memref<8x32xf32, #tpu.memory_space<vmem>>, %arg2: memref<8x32xf32, #tpu.memory_space<vmem>>, %arg3: memref<8x8xf32, #tpu.memory_space<vmem>>) attributes {dimension_semantics = [#tpu.dimension_semantics<parallel>], iteration_bounds = array<i64: 1>, scalar_prefetch = 0 : i64, scratch_operands = 0 : i64, tpu.core_type = #tpu.core_type<tc>, window_params = [{pipeline_mode = #tpu.pipeline_mode<synchronous>, transform_indices = @transform_0, window_bounds = array<i64: 8, 32>}, {transform_indices = @transform_1, window_bounds = array<i64: 8, 32>}, {transform_indices = @transform_2, window_bounds = array<i64: 8, 8>}]} {
    %c0 = arith.constant 0 : index
    %c0_0 = arith.constant 0 : index
    %0 = vector.load %arg2[%c0, %c0_0] : memref<8x32xf32, #tpu.memory_space<vmem>>, vector<8x32xf32>
    %1 = arith.mulf %0, %0 : vector<8x32xf32>
    %cst = arith.constant 1.000000e+00 : f32
    %2 = vector.broadcast %cst : f32 to vector<8x32xf32>
    %cst_1 = arith.constant dense<0.000000e+00> : vector<8x8xf32>
    %3 = tpu.matmul %2, %1, %cst_1 {dimension_numbers = #tpu.dot_dimension_numbers<[1], [1], [0], [0], [0, 0, 1, 0], [], []>} : vector<8x32xf32>, vector<8x32xf32>, vector<8x8xf32> -> vector<8x8xf32>
    %4 = vector.extract_strided_slice %3 {offsets = [0, 0], sizes = [1, 8], strides = [1, 1]} : vector<8x8xf32> to vector<1x8xf32>
    %cst_2 = arith.constant 1.000000e-16 : f32
    %5 = vector.broadcast %cst_2 : f32 to vector<1x8xf32>
    %6 = arith.maximumf %4, %5 : vector<1x8xf32>
    %7 = math.rsqrt %6 : vector<1x8xf32>
    %c0_3 = arith.constant 0 : index
    %c0_4 = arith.constant 0 : index
    %8 = vector.load %arg1[%c0_3, %c0_4] : memref<8x32xf32, #tpu.memory_space<vmem>>, vector<8x32xf32>
    %cst_5 = arith.constant dense<0.000000e+00> : vector<8x8xf32>
    %9 = tpu.matmul %8, %0, %cst_5 {dimension_numbers = #tpu.dot_dimension_numbers<[1], [1], [0], [0], [0, 0, 1, 0], [], []>} : vector<8x32xf32>, vector<8x32xf32>, vector<8x8xf32> -> vector<8x8xf32>
    %10 = vector.broadcast %7 : vector<1x8xf32> to vector<8x8xf32>
    %11 = arith.mulf %9, %10 : vector<8x8xf32>
    %c0_6 = arith.constant 0 : index
    %c0_7 = arith.constant 0 : index
    %12 = vector.load %arg3[%c0_6, %c0_7] : memref<8x8xf32, #tpu.memory_space<vmem>>, vector<8x8xf32>
    tpu.vector_store %arg3[%c0_6, %c0_7], %11 {strides = array<i32>} : memref<8x8xf32, #tpu.memory_space<vmem>>, vector<8x8xf32>,
    return
  }
  func.func @transform_0(%arg0: i32) -> (i32, i32) {
    %c0_i32 = arith.constant 0 : i32
    %c0_i32_0 = arith.constant 0 : i32
    %c0_i32_1 = arith.constant 0 : i32
    return %c0_i32, %c0_i32_0 : i32, i32
  }
  func.func @transform_1(%arg0: i32) -> (i32, i32) {
    %c0_i32 = arith.constant 0 : i32
    %c0_i32_0 = arith.constant 0 : i32
    return %arg0, %c0_i32 : i32, i32
  }
  func.func @transform_2(%arg0: i32) -> (i32, i32) {
    %c0_i32 = arith.constant 0 : i32
    %c0_i32_0 = arith.constant 0 : i32
    return %c0_i32, %arg0 : i32, i32
  }
}

</mosaic_0001>

<bundles_post_ra>
// kernel: tpu_custom_call.1
= control target key start
LH: loop header
LB: loop body
LE: loop exit
PB: predicated region body
PF: predicated region fallthrough
CT: control target
= control target key end

     0   :  { %7 = vsyncpa [#allocation3], 0  ;;  %s245_s0 = inlined_call_operand.hbm [shape: f32[8,32], index: 0, kind: input, shape index: {}]   ;;  %s246_s1 = inlined_call_operand.hbm [shape: f32[8,32], index: 1, kind: input, shape index: {}]   ;;  %s247_s2 = inlined_call_operand.hbm [shape: f32[8,8], index: 2, kind: output, shape index: {}]  }
   0x1   :  { %8 = vsyncpa [#allocation6], 0 }
   0x2   :  { %9 = vsyncpa [#allocation4], 0  ;;  %s15_s11 = sshll.u32 %s245_s0, 4  ;;  %s217_s12 = smov [#allocation2]   ;;  %s16_s11 = int_to_ptr.hbm [resolvable:$true] %s15_s11 }
   0x3   :  { %s17_s13 = sshll.u32 %s217_s12, 4  ;;  %s26_s16 = sshll.u32 %s246_s1, 4  ;;  %s18_s13 = int_to_ptr.vmem [resolvable:$true] %s17_s13  ;;  %s27_s16 = int_to_ptr.hbm [resolvable:$true] %s26_s16 }
   0x4   :  { %20 = dma.hbm_to_vmem [thread:$0]  %s16_s11, 128, %s18_s13, [#allocation3]  }
   0x5   :  { %s218_s17 = smov [#allocation5]  }
   0x6   :  { %s28_s18 = sshll.u32 %s218_s17, 4  ;;  %s29_s18 = int_to_ptr.vmem [resolvable:$true] %s28_s18 }
   0x7   :  { %31 = dma.hbm_to_vmem [thread:$0]  %s27_s16, 128, %s29_s18, [#allocation6]  }
   0x8   :  { %211 = dma.done.wait [#allocation3], 128  }
   0x9   :  { %212 = vsyncadd [#allocation3], 4294967168 }
   0xa   :  { %213 = dma.done.wait [#allocation6], 128  }
   0xb   :  { %214 = vsyncadd [#allocation6], 4294967168  ;;  %v40_v0 = vld [vmem:[#allocation5] sm:$0xff]  ;;  %vm42_vm0 = vcmask 261120   ;;  %v80_v2 = vld [vmem:[#allocation2] sm:$0xff]  ;;  %v219_v3 = vmov 1.0  }
   0xc   :  { %v41_v1 = vmul.f32 %v40_v0, %v40_v0  ;;  %131 = vmatpush.xpose.msk.msra.mxu1 %vm42_vm0, %v40_v0  ;;  %s220_s0 = smov [#allocation7]   ;;  %s118_s21 = sshll.u32 %s247_s2, 4  ;;  %vm109_vm4 = vcmask 64512   ;;  %s119_s21 = int_to_ptr.hbm [resolvable:$true] %s118_s21 }
   0xd   :  { %s116_s1 = sshll.u32 %s220_s0, 4  ;;  %s117_s1 = int_to_ptr.vmem [resolvable:$true] %s116_s1 }
   0xe   :  { %129 = vmatpush.xpose.msk.msra.mxu0 %vm42_vm0, %v41_v1 }
   0xf   :  { %132 = vmatmul.msk.f32.vlgmr.msra.gmra.mxu1 %vm42_vm0, %v80_v2 }
  0x11   :  { %130 = vmatmul.msk.f32.vlgmr.msra.gmra.mxu0 %vm42_vm0, %v219_v3 }
  0x8c   :  { %v104_v13 = vpop.f32.mrf.mxu1 }
  0x8e   :  { %v66_v4 = vpop.f32.mrf.mxu0 }
  0x8f   :  { %v69_v5 = vmax.f32 %v66_v4, 1e-16 }
  0x91   :  { %137 = vrsqrt.f32 %v69_v5  ;;  %vm76_vm2 = vweird.f32 %v69_v5 }
  0x97   :  { %v138_v6 = vpop.eup %137 }
  0x98   :  { %v71_v7 = vmul.f32 %v138_v6, %v69_v5  ;;  %vm77_vm1 = vweird.f32 %v138_v6 }
  0x99   :  { %vm78_vm3 = vmor %vm76_vm2, %vm77_vm1 }
  0x9a   :  { %v72_v8 = vmul.f32 %v138_v6, %v71_v7 }
  0x9c   :  { %v73_v9 = vmul.f32 0.5, %v72_v8 }
  0x9e   :  { %v74_v10 = vsub.f32 1.5, %v73_v9 }
  0xa0   :  { %v75_v11 = vmul.f32 %v138_v6, %v74_v10 }
  0xa2   :  { %v79_v12 = vsel %vm78_vm3, %v138_v6, %v75_v11 }
  0xa3   :  { %v107_v14 = vperm.slane %v79_v12, 0 }
  0xa5   :  { %v108_v15 = vmul.f32 %v107_v14, %v104_v13 }
  0xa7   :  { %110 = vst.msk [vmem:[#allocation7] sm:$0xff] %vm109_vm4, %v108_v15 }
  0xa8   :  { %121 = dma.vmem_to_hbm [thread:$0]  %s117_s1, 128, %s119_s21, [#allocation4]  }
  0xa9   :  { %215 = dma.done.wait [#allocation4], 128  }
  0xaa   :  { %216 = vsyncadd [#allocation4], 4294967168 }
  0xab   :  { %126 = vsyncpa [#allocation3], 1 }
  0xac   :  { %127 = vsyncpa [#allocation6], 1 }
  0xad   :  { %128 = vsyncpa [#allocation4], 1 }

</bundles_post_ra>
